<compile_context>
chip_gen: v7x
topology: tpu7x:2x2x1
jax: 0.10.0
libtpu: 0.0.40
codegen_flags: <defaults>
</compile_context>

<pallas_src>
import numpy as np
import jax
import jax.numpy as jnp
from jax import lax
from jax.experimental import pallas as pl
from jax.experimental.pallas import tpu as pltpu

# ----- small config consistent with SoftOrdering1DCNN.__init__ -----
INPUT_DIM = 16
OUTPUT_DIM = 4
SIGN = 8          # sign_size
CHA_IN = 4        # cha_input
CHA_HID = 8       # cha_hidden
K = 2
BATCH = 2

S1 = SIGN
S2 = SIGN // 2
S4 = SIGN // 4
HIDDEN = S1 * S1 * CHA_IN        # 256 = hidden_size
OUT_SIZE = S4 * S4 * CHA_HID     # 32  = output_size
BN_EPS = 1e-5


# ----------------------------- the single fused Pallas kernel -----------------------------

def _fused_forward_kernel(x_ref, wa_ref, ba_ref, wb_ref, bb_ref, wc_ref, bc_ref,
                          wd_ref, bd_ref, we_ref, be_ref, wf_ref, bf_ref, o_ref):
    f32 = jnp.float32

    def mm(a, w_ref, b_ref):
        # (B, K) @ (K, N) on the MXU, f32 accumulation, default precision.
        return jnp.dot(a, w_ref[...], preferred_element_type=f32) + b_ref[...]

    # bn1 -> dropout1(id) -> dense1 -> CELU                        (B,16)  @ (16,256)
    h = mm(x_ref[...], wa_ref, ba_ref)
    h = jnp.maximum(h, 0.0) + jnp.minimum(jnp.exp(jnp.minimum(h, 0.0)) - 1.0, 0.0)
    # bn_c1 -> conv1 (depthwise 5x5, pad 2) -> relu                (B,256) @ (256,512)
    h = jnp.maximum(mm(h, wb_ref, bb_ref), 0.0)
    # AdaptiveAvgPool(8->4) -> bn_c2 -> dropout(id) -> conv2(3x3) -> relu  (B,512)@(512,128)
    xs = jnp.maximum(mm(h, wc_ref, bc_ref), 0.0)                   # residual source x_s
    # bn_c3 -> dropout(id) -> conv3 (3x3, pad 1) -> relu           (B,128) @ (128,128)
    h = jnp.maximum(mm(xs, wd_ref, bd_ref), 0.0)
    # bn_c4 -> conv4 (depthwise 5x5, pad 2) -> + x_s -> relu       (B,128) @ (128,128)
    h = jnp.maximum(mm(h, we_ref, be_ref) + xs, 0.0)
    # AvgPool2d(4, stride 2, pad 1) -> flatten -> bn2 -> dropout(id) -> dense2  (B,128)@(128,4)
    o_ref[...] = mm(h, wf_ref, bf_ref)


def forward_pallas(x, f):
    b = x.shape[0]
    vmem_spec = pl.BlockSpec(memory_space=pltpu.MemorySpace.VMEM)
    return pl.pallas_call(
        _fused_forward_kernel,
        out_shape=jax.ShapeDtypeStruct((b, OUTPUT_DIM), jnp.float32),
        in_specs=[vmem_spec] * 13,
        out_specs=vmem_spec,
    )(x, f["wa"], f["ba"], f["wb"], f["bb"], f["wc"], f["bc"],
      f["wd"], f["bd"], f["we"], f["be"], f["wf"], f["bf"])


# ------------------- one-time weight preprocessing (host-side NumPy, float64) -------------------
# Convs become exact Toeplitz matrices acting on the flattened (C*H*W) feature axis
# (flat index = c*H*W + h*W + w, matching PyTorch reshape/flatten).  BN scale is folded into
# the matrix; BN shift becomes an exact bias (zero padding is baked into the matrix).

def _conv_to_matrix_np(w, ci, H, W, pad, groups):
    """T with shape (ci*H*W, co*H*W) such that flat(conv2d(x)) == flat(x) @ T."""
    w = np.asarray(w, np.float64)
    co, cig, kh, kw = w.shape
    cpg_out = co // groups
    T = np.zeros((ci, H, W, co, H, W), np.float64)
    for oc in range(co):
        g = oc // cpg_out
        for icg in range(cig):
            ic = g * cig + icg
            for ky in range(kh):
                for kx in range(kw):
                    wv = w[oc, icg, ky, kx]
                    for oy in range(H):
                        iy = oy + ky - pad
                        if not (0 <= iy < H):
                            continue
                        for ox in range(W):
                            ix = ox + kx - pad
                            if 0 <= ix < W:
                                T[ic, iy, ix, oc, oy, ox] += wv
    return T.reshape(ci * H * W, co * H * W)


def _avgpool2x2_matrix_np(c, s):
    """2x2 / stride-2 mean (== AdaptiveAvgPool2d(s//2) for even s) as (c*s*s, c*(s//2)^2)."""
    s2 = s // 2
    m = np.zeros((c, s, s, c, s2, s2), np.float64)
    for ch in range(c):
        for oh in range(s2):
            for ow in range(s2):
                for dy in range(2):
                    for dx in range(2):
                        m[ch, 2 * oh + dy, 2 * ow + dx, ch, oh, ow] = 0.25
    return m.reshape(c * s * s, c * s2 * s2)


def _avgpool4s2p1_matrix_np(c, s):
    """AvgPool2d(kernel=4, stride=2, padding=1, count_include_pad=True) as a matrix."""
    so = (s + 2 - 4) // 2 + 1
    m = np.zeros((c, s, s, c, so, so), np.float64)
    for ch in range(c):
        for oh in range(so):
            for ow in range(so):
                for iy in range(max(0, 2 * oh - 1), min(s, 2 * oh + 3)):
                    for ix in range(max(0, 2 * ow - 1), min(s, 2 * ow + 3)):
                        m[ch, iy, ix, ch, oh, ow] = 1.0 / 16.0
    return m.reshape(c * s * s, c * so * so)


def prepare_fused(p):
    pf = {k: np.asarray(v, np.float64) for k, v in p.items()}
    # Stage A: bn1 -> dense1
    wa = pf["bn1_s"][:, None] * pf["w1_t"]                                   # (16, 256)
    ba = (pf["bn1_t"] @ pf["w1_t"])[None, :]                                 # (1, 256)
    # Stage B: bn_c1 -> conv1 (depthwise, groups=CHA_IN)
    t1 = _conv_to_matrix_np(pf["wc1"], CHA_IN, S1, S1, pad=2, groups=CHA_IN)  # (256, 512)
    s = np.repeat(pf["bnc1_s"], S1 * S1); t = np.repeat(pf["bnc1_t"], S1 * S1)
    wb = s[:, None] * t1
    bb = (t @ t1)[None, :]
    # Stage C: AdaptiveAvgPool(8->4) -> bn_c2 -> conv2 (3x3)
    p1 = _avgpool2x2_matrix_np(CHA_IN * K, S1)                                # (512, 128)
    t2 = _conv_to_matrix_np(pf["wc2"], CHA_IN * K, S2, S2, pad=1, groups=1)   # (128, 128)
    s = np.repeat(pf["bnc2_s"], S2 * S2); t = np.repeat(pf["bnc2_t"], S2 * S2)
    wc = p1 @ (s[:, None] * t2)                                               # (512, 128)
    bc = (t @ t2)[None, :]
    # Stage D: bn_c3 -> conv3 (3x3)
    t3 = _conv_to_matrix_np(pf["wc3"], CHA_HID, S2, S2, pad=1, groups=1)      # (128, 128)
    s = np.repeat(pf["bnc3_s"], S2 * S2); t = np.repeat(pf["bnc3_t"], S2 * S2)
    wd = s[:, None] * t3
    bd = (t @ t3)[None, :]
    # Stage E: bn_c4 -> conv4 (depthwise, groups=CHA_HID)
    t4 = _conv_to_matrix_np(pf["wc4"], CHA_HID, S2, S2, pad=2, groups=CHA_HID)  # (128, 128)
    s = np.repeat(pf["bnc4_s"], S2 * S2); t = np.repeat(pf["bnc4_t"], S2 * S2)
    we = s[:, None] * t4
    be = (t @ t4)[None, :]
    # Stage F: AvgPool2d(4,2,1) -> flatten -> bn2 -> dense2
    q = _avgpool4s2p1_matrix_np(CHA_HID, S2)                                  # (128, 32)
    wf = q @ (pf["bn2_s"][:, None] * pf["w2_t"])                              # (128, 4)
    bf = (pf["bn2_t"] @ pf["w2_t"])[None, :]                                  # (1, 4)
    fused = dict(wa=wa, ba=ba, wb=wb, bb=bb, wc=wc, bc=bc,
                 wd=wd, bd=bd, we=we, be=be, wf=wf, bf=bf)
    return {k: jnp.asarray(np.asarray(v, np.float32)) for k, v in fused.items()}


# ----------------------------- parameters (deterministic, synthetic) -----------------------------

def _bn_affine(key, n):
    k1, k2, k3, k4 = jax.random.split(key, 4)
    gamma = 1.0 + 0.1 * jax.random.normal(k1, (n,), jnp.float32)
    beta = 0.1 * jax.random.normal(k2, (n,), jnp.float32)
    mean = 0.1 * jax.random.normal(k3, (n,), jnp.float32)
    var = 1.0 + 0.1 * jnp.abs(jax.random.normal(k4, (n,), jnp.float32))
    s = gamma * lax.rsqrt(var + BN_EPS)
    t = beta - mean * s
    return s, t


def _weight_norm_linear(key, out_f, in_f):
    k1, k2 = jax.random.split(key)
    v = 0.1 * jax.random.normal(k1, (out_f, in_f), jnp.float32)
    g = 1.0 + 0.1 * jnp.abs(jax.random.normal(k2, (out_f,), jnp.float32))
    # nn.utils.weight_norm(Linear) default dim=0: w = g * v / ||v||_row
    return g[:, None] * v / jnp.linalg.norm(v, axis=1, keepdims=True)


def _weight_norm_conv(key, shape):
    k1, k2 = jax.random.split(key)
    v = 0.1 * jax.random.normal(k1, shape, jnp.float32)
    g = 1.0 + 0.1 * jnp.abs(jax.random.normal(k2, (), jnp.float32))
    # nn.utils.weight_norm(Conv2d, dim=None): w = g * v / ||v||_Frobenius
    return g * v / jnp.linalg.norm(v.reshape(-1))


def init_params(key):
    ks = jax.random.split(key, 8)
    bn1_s, bn1_t = _bn_affine(ks[0], INPUT_DIM)
    bnc1_s, bnc1_t = _bn_affine(jax.random.fold_in(ks[1], 0), CHA_IN)
    bnc2_s, bnc2_t = _bn_affine(jax.random.fold_in(ks[1], 1), CHA_IN * K)
    bnc3_s, bnc3_t = _bn_affine(jax.random.fold_in(ks[1], 2), CHA_HID)
    bnc4_s, bnc4_t = _bn_affine(jax.random.fold_in(ks[1], 3), CHA_HID)
    bn2_s, bn2_t = _bn_affine(ks[2], OUT_SIZE)
    w1 = _weight_norm_linear(ks[3], HIDDEN, INPUT_DIM)               # (HIDDEN, INPUT_DIM)
    wc1 = _weight_norm_conv(ks[4], (CHA_IN * K, 1, 5, 5))            # depthwise, groups=CHA_IN
    wc2 = _weight_norm_conv(ks[5], (CHA_HID, CHA_IN * K, 3, 3))
    wc3 = _weight_norm_conv(ks[6], (CHA_HID, CHA_HID, 3, 3))
    wc4 = _weight_norm_conv(jax.random.fold_in(ks[6], 1), (CHA_HID, 1, 5, 5))  # depthwise
    w2 = _weight_norm_linear(ks[7], OUTPUT_DIM, OUT_SIZE)            # (OUTPUT_DIM, OUT_SIZE)
    return dict(
        bn1_s=bn1_s, bn1_t=bn1_t, bnc1_s=bnc1_s, bnc1_t=bnc1_t,
        bnc2_s=bnc2_s, bnc2_t=bnc2_t, bnc3_s=bnc3_s, bnc3_t=bnc3_t,
        bnc4_s=bnc4_s, bnc4_t=bnc4_t, bn2_s=bn2_s, bn2_t=bn2_t,
        w1_t=w1.T, wc1=wc1, wc2=wc2, wc3=wc3, wc4=wc4, w2_t=w2.T,
    )


# ----------------------- host-side NumPy float64 reference (validation only) -----------------------

def _conv2d_np(x, w, pad, groups):
    B, Ci, H, W = x.shape
    Co, cig, kh, kw = w.shape
    cpg_out = Co // groups
    xp = np.pad(x, ((0, 0), (0, 0), (pad, pad), (pad, pad)))
    out = np.zeros((B, Co, H, W), np.float64)
    for oc in range(Co):
        g = oc // cpg_out
        for icg in range(cig):
            ic = g * cig + icg
            for ky in range(kh):
                for kx in range(kw):
                    out[:, oc] += w[oc, icg, ky, kx] * xp[:, ic, ky:ky + H, kx:kx + W]
    return out


def forward_ref_np(x, p):
    pf = {k: np.asarray(v, np.float64) for k, v in p.items()}
    x = np.asarray(x, np.float64)
    b = x.shape[0]
    h = x * pf["bn1_s"] + pf["bn1_t"]
    h = h @ pf["w1_t"]
    h = np.where(h > 0, h, np.expm1(np.minimum(h, 0.0)))            # CELU(alpha=1)
    h = h.reshape(b, CHA_IN, S1, S1)
    h = h * pf["bnc1_s"][None, :, None, None] + pf["bnc1_t"][None, :, None, None]
    h = np.maximum(_conv2d_np(h, pf["wc1"], 2, CHA_IN), 0.0)
    h = h.reshape(b, CHA_IN * K, S2, 2, S2, 2).mean(axis=(3, 5))    # AdaptiveAvgPool(8->4)
    h = h * pf["bnc2_s"][None, :, None, None] + pf["bnc2_t"][None, :, None, None]
    h = np.maximum(_conv2d_np(h, pf["wc2"], 1, 1), 0.0)
    x_s = h
    h = h * pf["bnc3_s"][None, :, None, None] + pf["bnc3_t"][None, :, None, None]
    h = np.maximum(_conv2d_np(h, pf["wc3"], 1, 1), 0.0)
    h = h * pf["bnc4_s"][None, :, None, None] + pf["bnc4_t"][None, :, None, None]
    h = _conv2d_np(h, pf["wc4"], 2, CHA_HID)
    h = np.maximum(h + x_s, 0.0)
    # AvgPool2d(kernel=4, stride=2, padding=1, count_include_pad=True)
    hp = np.pad(h, ((0, 0), (0, 0), (1, 1), (1, 1)))
    so = (S2 + 2 - 4) // 2 + 1
    pooled = np.zeros((b, CHA_HID, so, so), np.float64)
    for oy in range(so):
        for ox in range(so):
            pooled[:, :, oy, ox] = hp[:, :, 2 * oy:2 * oy + 4, 2 * ox:2 * ox + 4].mean(axis=(2, 3))
    h = pooled.reshape(b, OUT_SIZE)
    h = h * pf["bn2_s"] + pf["bn2_t"]
    return h @ pf["w2_t"]


# ----------------------------- main -----------------------------

if __name__ == "__main__":
    key = jax.random.PRNGKey(0)
    kx, kp = jax.random.split(key)
    x = jax.random.normal(kx, (BATCH, INPUT_DIM), jnp.float32)
    params = init_params(kp)

    # One-time weight preprocessing (conv->Toeplitz, BN folding, pooling matrices) on host.
    fused = prepare_fused(params)

    out = jax.jit(forward_pallas)(x, fused)
    out = jax.block_until_ready(out)
    assert out.shape == (BATCH, OUTPUT_DIM)

    ref = forward_ref_np(np.asarray(x), params)
    np.testing.assert_allclose(np.asarray(out), ref, rtol=2e-2, atol=2e-2)
    print("KERNEL_OK")
</pallas_src>

<mosaic_0001>
module attributes {stable_mosaic.version = 11 : i64} {
  func.func @_fused_forward_kernel(%arg0: memref<2x16xf32, #tpu.memory_space<vmem>>, %arg1: memref<16x256xf32, #tpu.memory_space<vmem>>, %arg2: memref<1x256xf32, #tpu.memory_space<vmem>>, %arg3: memref<256x512xf32, #tpu.memory_space<vmem>>, %arg4: memref<1x512xf32, #tpu.memory_space<vmem>>, %arg5: memref<512x128xf32, #tpu.memory_space<vmem>>, %arg6: memref<1x128xf32, #tpu.memory_space<vmem>>, %arg7: memref<128x128xf32, #tpu.memory_space<vmem>>, %arg8: memref<1x128xf32, #tpu.memory_space<vmem>>, %arg9: memref<128x128xf32, #tpu.memory_space<vmem>>, %arg10: memref<1x128xf32, #tpu.memory_space<vmem>>, %arg11: memref<128x4xf32, #tpu.memory_space<vmem>>, %arg12: memref<1x4xf32, #tpu.memory_space<vmem>>, %arg13: memref<2x4xf32, #tpu.memory_space<vmem>>) attributes {dimension_semantics = [], scalar_prefetch = 0 : i64, scratch_operands = 0 : i64, tpu.core_type = #tpu.core_type<tc>} {
    %c0 = arith.constant 0 : index
    %c0_0 = arith.constant 0 : index
    %0 = vector.load %arg0[%c0, %c0_0] : memref<2x16xf32, #tpu.memory_space<vmem>>, vector<2x16xf32>
    %c0_1 = arith.constant 0 : index
    %c0_2 = arith.constant 0 : index
    %1 = vector.load %arg1[%c0_1, %c0_2] : memref<16x256xf32, #tpu.memory_space<vmem>>, vector<16x256xf32>
    %cst = arith.constant dense<0.000000e+00> : vector<2x256xf32>
    %2 = tpu.matmul %0, %1, %cst {dimension_numbers = #tpu.dot_dimension_numbers<[1], [0], [0], [1], [0, 0, 1, 1], [], []>} : vector<2x16xf32>, vector<16x256xf32>, vector<2x256xf32> -> vector<2x256xf32>
    %c0_3 = arith.constant 0 : index
    %c0_4 = arith.constant 0 : index
    %3 = vector.load %arg2[%c0_3, %c0_4] : memref<1x256xf32, #tpu.memory_space<vmem>>, vector<1x256xf32>
    %4 = vector.broadcast %3 : vector<1x256xf32> to vector<2x256xf32>
    %5 = arith.addf %2, %4 : vector<2x256xf32>
    %cst_5 = arith.constant 0.000000e+00 : f32
    %6 = vector.broadcast %cst_5 : f32 to vector<2x256xf32>
    %7 = arith.maximumf %5, %6 : vector<2x256xf32>
    %cst_6 = arith.constant 0.000000e+00 : f32
    %8 = vector.broadcast %cst_6 : f32 to vector<2x256xf32>
    %9 = arith.minimumf %5, %8 : vector<2x256xf32>
    %10 = math.exp %9 : vector<2x256xf32>
    %cst_7 = arith.constant 1.000000e+00 : f32
    %11 = vector.broadcast %cst_7 : f32 to vector<2x256xf32>
    %12 = arith.subf %10, %11 : vector<2x256xf32>
    %cst_8 = arith.constant 0.000000e+00 : f32
    %13 = vector.broadcast %cst_8 : f32 to vector<2x256xf32>
    %14 = arith.minimumf %12, %13 : vector<2x256xf32>
    %15 = arith.addf %7, %14 : vector<2x256xf32>
    %c0_9 = arith.constant 0 : index
    %c0_10 = arith.constant 0 : index
    %16 = vector.load %arg3[%c0_9, %c0_10] : memref<256x512xf32, #tpu.memory_space<vmem>>, vector<256x512xf32>
    %cst_11 = arith.constant dense<0.000000e+00> : vector<2x512xf32>
    %17 = tpu.matmul %15, %16, %cst_11 {dimension_numbers = #tpu.dot_dimension_numbers<[1], [0], [0], [1], [0, 0, 1, 1], [], []>} : vector<2x256xf32>, vector<256x512xf32>, vector<2x512xf32> -> vector<2x512xf32>
    %c0_12 = arith.constant 0 : index
    %c0_13 = arith.constant 0 : index
    %18 = vector.load %arg4[%c0_12, %c0_13] : memref<1x512xf32, #tpu.memory_space<vmem>>, vector<1x512xf32>
    %19 = vector.broadcast %18 : vector<1x512xf32> to vector<2x512xf32>
    %20 = arith.addf %17, %19 : vector<2x512xf32>
    %cst_14 = arith.constant 0.000000e+00 : f32
    %21 = vector.broadcast %cst_14 : f32 to vector<2x512xf32>
    %22 = arith.maximumf %20, %21 : vector<2x512xf32>
    %c0_15 = arith.constant 0 : index
    %c0_16 = arith.constant 0 : index
    %23 = vector.load %arg5[%c0_15, %c0_16] : memref<512x128xf32, #tpu.memory_space<vmem>>, vector<512x128xf32>
    %cst_17 = arith.constant dense<0.000000e+00> : vector<2x128xf32>
    %24 = tpu.matmul %22, %23, %cst_17 {dimension_numbers = #tpu.dot_dimension_numbers<[1], [0], [0], [1], [0, 0, 1, 1], [], []>} : vector<2x512xf32>, vector<512x128xf32>, vector<2x128xf32> -> vector<2x128xf32>
    %c0_18 = arith.constant 0 : index
    %c0_19 = arith.constant 0 : index
    %25 = vector.load %arg6[%c0_18, %c0_19] : memref<1x128xf32, #tpu.memory_space<vmem>>, vector<1x128xf32>
    %26 = vector.broadcast %25 : vector<1x128xf32> to vector<2x128xf32>
    %27 = arith.addf %24, %26 : vector<2x128xf32>
    %cst_20 = arith.constant 0.000000e+00 : f32
    %28 = vector.broadcast %cst_20 : f32 to vector<2x128xf32>
    %29 = arith.maximumf %27, %28 : vector<2x128xf32>
    %c0_21 = arith.constant 0 : index
    %c0_22 = arith.constant 0 : index
    %30 = vector.load %arg7[%c0_21, %c0_22] : memref<128x128xf32, #tpu.memory_space<vmem>>, vector<128x128xf32>
    %cst_23 = arith.constant dense<0.000000e+00> : vector<2x128xf32>
    %31 = tpu.matmul %29, %30, %cst_23 {dimension_numbers = #tpu.dot_dimension_numbers<[1], [0], [0], [1], [0, 0, 1, 1], [], []>} : vector<2x128xf32>, vector<128x128xf32>, vector<2x128xf32> -> vector<2x128xf32>
    %c0_24 = arith.constant 0 : index
    %c0_25 = arith.constant 0 : index
    %32 = vector.load %arg8[%c0_24, %c0_25] : memref<1x128xf32, #tpu.memory_space<vmem>>, vector<1x128xf32>
    %33 = vector.broadcast %32 : vector<1x128xf32> to vector<2x128xf32>
    %34 = arith.addf %31, %33 : vector<2x128xf32>
    %cst_26 = arith.constant 0.000000e+00 : f32
    %35 = vector.broadcast %cst_26 : f32 to vector<2x128xf32>
    %36 = arith.maximumf %34, %35 : vector<2x128xf32>
    %c0_27 = arith.constant 0 : index
    %c0_28 = arith.constant 0 : index
    %37 = vector.load %arg9[%c0_27, %c0_28] : memref<128x128xf32, #tpu.memory_space<vmem>>, vector<128x128xf32>
    %cst_29 = arith.constant dense<0.000000e+00> : vector<2x128xf32>
    %38 = tpu.matmul %36, %37, %cst_29 {dimension_numbers = #tpu.dot_dimension_numbers<[1], [0], [0], [1], [0, 0, 1, 1], [], []>} : vector<2x128xf32>, vector<128x128xf32>, vector<2x128xf32> -> vector<2x128xf32>
    %c0_30 = arith.constant 0 : index
    %c0_31 = arith.constant 0 : index
    %39 = vector.load %arg10[%c0_30, %c0_31] : memref<1x128xf32, #tpu.memory_space<vmem>>, vector<1x128xf32>
    %40 = vector.broadcast %39 : vector<1x128xf32> to vector<2x128xf32>
    %41 = arith.addf %38, %40 : vector<2x128xf32>
    %42 = arith.addf %41, %29 : vector<2x128xf32>
    %cst_32 = arith.constant 0.000000e+00 : f32
    %43 = vector.broadcast %cst_32 : f32 to vector<2x128xf32>
    %44 = arith.maximumf %42, %43 : vector<2x128xf32>
    %c0_33 = arith.constant 0 : index
    %c0_34 = arith.constant 0 : index
    %45 = vector.load %arg11[%c0_33, %c0_34] : memref<128x4xf32, #tpu.memory_space<vmem>>, vector<128x4xf32>
    %cst_35 = arith.constant dense<0.000000e+00> : vector<2x4xf32>
    %46 = tpu.matmul %44, %45, %cst_35 {dimension_numbers = #tpu.dot_dimension_numbers<[1], [0], [0], [1], [0, 0, 1, 1], [], []>} : vector<2x128xf32>, vector<128x4xf32>, vector<2x4xf32> -> vector<2x4xf32>
    %c0_36 = arith.constant 0 : index
    %c0_37 = arith.constant 0 : index
    %47 = vector.load %arg12[%c0_36, %c0_37] : memref<1x4xf32, #tpu.memory_space<vmem>>, vector<1x4xf32>
    %48 = vector.broadcast %47 : vector<1x4xf32> to vector<2x4xf32>
    %49 = arith.addf %46, %48 : vector<2x4xf32>
    %c0_38 = arith.constant 0 : index
    %c0_39 = arith.constant 0 : index
    %50 = vector.load %arg13[%c0_38, %c0_39] : memref<2x4xf32, #tpu.memory_space<vmem>>, vector<2x4xf32>
    tpu.vector_store %arg13[%c0_38, %c0_39], %49 {strides = array<i32>} : memref<2x4xf32, #tpu.memory_space<vmem>>, vector<2x4xf32>,
    return
  }
}

</mosaic_0001>

<bundles_post_ra>
// kernel: forward_pallas.1
= control target key start
LH: loop header
LB: loop body
LE: loop exit
PB: predicated region body
PF: predicated region fallthrough
CT: control target
= control target key end

     0   :  { %18 = vsyncpa [#allocation3], 0  ;;  %s2054_s0 = inlined_call_operand.vmem [shape: f32[2,16], index: 0, kind: input, shape index: {}]   ;;  %s2055_s1 = inlined_call_operand.vmem [shape: f32[16,256], index: 1, kind: input, shape index: {}]   ;;  %s2056_s2 = inlined_call_operand.vmem [shape: f32[1,256], index: 2, kind: input, shape index: {}]   ;;  %s2057_s3 = inlined_call_operand.hbm [shape: f32[256,512], index: 3, kind: input, shape index: {}]   ;;  %s2058_s4 = inlined_call_operand.vmem [shape: f32[1,512], index: 4, kind: input, shape index: {}]   ;;  %s2059_s5 = inlined_call_operand.hbm [shape: f32[512,128], index: 5, kind: input, shape index: {}]   ;;  %s2060_s6 = inlined_call_operand.vmem [shape: f32[1,128], index: 6, kind: input, shape index: {}]   ;;  %s2061_s7 = inlined_call_operand.vmem [shape: f32[128,128], index: 7, kind: input, shape index: {}]   ;;  %s2062_s8 = inlined_call_operand.hbm [shape: f32[1,128], index: 8, kind: input, shape index: {}]   ;;  %s2063_s9 = inlined_call_operand.hbm [shape: f32[128,128], index: 9, kind: input, shape index: {}]   ;;  %s2064_s10 = inlined_call_operand.hbm [shape: f32[1,128], index: 10, kind: input, shape index: {}]   ;;  %s2065_s11 = inlined_call_operand.vmem [shape: f32[128,4], index: 11, kind: input, shape index: {}]   ;;  %s2066_s12 = inlined_call_operand.hbm [shape: f32[1,4], index: 12, kind: input, shape index: {}]   ;;  %s2067_s13 = inlined_call_operand.hbm [shape: f32[2,4], index: 13, kind: output, shape index: {}]  }
   0x1   :  { %19 = vsyncpa [#allocation6], 0 }
   0x2   :  { %20 = vsyncpa [#allocation9], 0 }
   0x3   :  { %21 = vsyncpa [#allocation12], 0 }
   0x4   :  { %22 = vsyncpa [#allocation4], 0  ;;  %s1720_s25 = smov [#allocation5]   ;;  %s1556_s29 = scalar_lea.hbm %s2059_s5, 8192 }
   0x5   :  { %s48_s26 = sshll.u32 %s1720_s25, 4  ;;  %p1557_p0 = scmp.ne.s32.totalorder %s2059_s5, %s1556_s29  ;;  %s49_s26 = int_to_ptr.vmem [resolvable:$true] %s48_s26 }
   0x6   :  { %p1560_p1 = scmp.lt.u32.totalorder %s1556_s29, %s2059_s5 }
   0x8   :  { %p1562_p2 = pnand %p1560_p1, %p1557_p0 }
   0xa   :  { %1565 = shalt.err (!%p1562_p2)
}
   0xb   :  { %s1566_s17 = scalar_lea.vmem %s49_s26, 8192  ;;  %p1571_p4 = scmp.lt.s32.totalorder %s49_s26, %s49_s26 }
   0xc   :  { %p1567_p3 = scmp.ne.s32.totalorder %s49_s26, %s1566_s17  ;;  %p1572_p5 = scmp.lt.s32.totalorder %s1566_s17, %s1566_s17 }
   0xe   :  { %p1573_p6 = por %p1572_p5, %p1571_p4 }
  0x10   :  { %p1574_p7 = pnand %p1573_p6, %p1567_p3 }
  0x12   :  { %1577 = shalt.err (!%p1574_p7)
}
  0x13   :  { %s1721_s18 = smov 128   ;;  %s1722_s19 = smov 8  }
  0x14   :  { %54 = dma.hbm_to_vmem [thread:$0]  %s2059_s5, 8192, %s49_s26, [#allocation6], %s1721_s18, %s1721_s18, %s1722_s19  }
  0x15   :  { %s1723_s22 = smov [#allocation8]   ;;  %s1724_s24 = smov [#allocation2]  }
  0x16   :  { %s74_s23 = sshll.u32 %s1723_s22, 4  ;;  %s34_s25 = sshll.u32 %s1724_s24, 4  ;;  %s75_s23 = int_to_ptr.vmem [resolvable:$true] %s74_s23  ;;  %s35_s25 = int_to_ptr.vmem [resolvable:$true] %s34_s25 }
  0x17   :  { %s1578_s29 = scalar_lea.hbm %s2063_s9, 2048 }
  0x18   :  { %p1579_p8 = scmp.ne.s32.totalorder %s2063_s9, %s1578_s29  ;;  %p1582_p9 = scmp.lt.u32.totalorder %s1578_s29, %s2063_s9 }
  0x1a   :  { %p1584_p10 = pnand %p1582_p9, %p1579_p8 }
  0x1c   :  { %1587 = shalt.err (!%p1584_p10)
}
  0x1d   :  { %s1588_s5 = scalar_lea.vmem %s75_s23, 2048  ;;  %p1593_p12 = scmp.lt.s32.totalorder %s75_s23, %s75_s23 }
  0x1e   :  { %p1589_p11 = scmp.ne.s32.totalorder %s75_s23, %s1588_s5  ;;  %p1594_p13 = scmp.lt.s32.totalorder %s1588_s5, %s1588_s5 }
  0x20   :  { %p1595_p0 = por %p1594_p13, %p1593_p12 }
  0x22   :  { %p1596_p1 = pnand %p1595_p0, %p1589_p11 }
  0x24   :  { %1599 = shalt.err (!%p1596_p1)
}
  0x25   :  { %80 = dma.hbm_to_vmem [thread:$0]  %s2063_s9, 2048, %s75_s23, [#allocation9], %s1721_s18, %s1721_s18, %s1722_s19  }
  0x26   :  { %s1600_s22 = scalar_lea.hbm %s2057_s3, 16384 }
  0x27   :  { %p1601_p2 = scmp.ne.s32.totalorder %s2057_s3, %s1600_s22  ;;  %p1604_p3 = scmp.lt.u32.totalorder %s1600_s22, %s2057_s3 }
  0x29   :  { %p1606_p4 = pnand %p1604_p3, %p1601_p2 }
  0x2b   :  { %1609 = shalt.err (!%p1606_p4)
}
  0x2c   :  { %s1610_s30 = scalar_lea.vmem %s35_s25, 16384  ;;  %p1615_p6 = scmp.lt.s32.totalorder %s35_s25, %s35_s25 }
  0x2d   :  { %p1611_p5 = scmp.ne.s32.totalorder %s35_s25, %s1610_s30  ;;  %p1616_p7 = scmp.lt.s32.totalorder %s1610_s30, %s1610_s30 }
  0x2f   :  { %p1617_p8 = por %p1616_p7, %p1615_p6 }
  0x31   :  { %p1618_p9 = pnand %p1617_p8, %p1611_p5 }
  0x33   :  { %1621 = shalt.err (!%p1618_p9)
}
  0x34   :  { %s1725_s9 = smov 512   ;;  %s1726_s18 = smov 32  }
  0x35   :  { %40 = dma.hbm_to_vmem [thread:$0]  %s2057_s3, 16384, %s35_s25, [#allocation3], %s1725_s9, %s1725_s9, %s1726_s18  }
  0x36   :  { %s1727_s14 = smov [#allocation7]   ;;  %s1728_s16 = smov [#allocation10]  }
  0x37   :  { %s65_s15 = sshll.u32 %s1727_s14, 4  ;;  %s87_s5 = sshll.u32 %s1728_s16, 4  ;;  %s66_s15 = int_to_ptr.vmem [resolvable:$true] %s65_s15  ;;  %s88_s5 = int_to_ptr.vmem [resolvable:$true] %s87_s5 }
  0x38   :  { %s1622_s20 = scalar_lea.hbm %s2062_s8, 16 }
  0x39   :  { %p1623_p10 = scmp.ne.s32.totalorder %s2062_s8, %s1622_s20  ;;  %p1626_p11 = scmp.lt.u32.totalorder %s1622_s20, %s2062_s8 }
  0x3b   :  { %p1628_p12 = pnand %p1626_p11, %p1623_p10 }
  0x3d   :  { %1631 = shalt.err (!%p1628_p12)
}
  0x3e   :  { %s1632_s3 = scalar_lea.vmem %s66_s15, 16  ;;  %s1636_s25 = scalar_lea.vmem %s66_s15, 32 }
  0x3f   :  { %p1633_p13 = scmp.ne.s32.totalorder %s66_s15, %s1632_s3  ;;  %p1637_p0 = scmp.lt.s32.totalorder %s66_s15, %s66_s15 }
  0x40   :  { %p1638_p1 = scmp.lt.s32.totalorder %s1636_s25, %s1632_s3 }
  0x42   :  { %p1639_p2 = por %p1638_p1, %p1637_p0 }
  0x44   :  { %p1640_p3 = pnand %p1639_p2, %p1633_p13 }
  0x46   :  { %1643 = shalt.err (!%p1640_p3)
}
  0x47   :  { %68 = dma.hbm_to_vmem [thread:$0]  %s2062_s8, 16, %s66_s15, [#allocation6]  }
  0x48   :  { %s1644_s18 = scalar_lea.hbm %s2064_s10, 16 }
  0x49   :  { %p1645_p4 = scmp.ne.s32.totalorder %s2064_s10, %s1644_s18  ;;  %p1648_p5 = scmp.lt.u32.totalorder %s1644_s18, %s2064_s10 }
  0x4b   :  { %p1650_p6 = pnand %p1648_p5, %p1645_p4 }
  0x4d   :  { %1653 = shalt.err (!%p1650_p6)
}
  0x4e   :  { %s1654_s26 = scalar_lea.vmem %s88_s5, 16  ;;  %s1658_s17 = scalar_lea.vmem %s88_s5, 32 }
  0x4f   :  { %p1655_p7 = scmp.ne.s32.totalorder %s88_s5, %s1654_s26  ;;  %p1659_p8 = scmp.lt.s32.totalorder %s88_s5, %s88_s5 }
  0x50   :  { %p1660_p9 = scmp.lt.s32.totalorder %s1658_s17, %s1654_s26 }
  0x52   :  { %p1661_p10 = por %p1660_p9, %p1659_p8 }
  0x54   :  { %p1662_p11 = pnand %p1661_p10, %p1655_p7 }
  0x56   :  { %1665 = shalt.err (!%p1662_p11)
}
  0x57   :  { %90 = dma.hbm_to_vmem [thread:$0]  %s2064_s10, 16, %s88_s5, [#allocation9]  }
  0x58   :  { %s1729_s20 = smov [#allocation11]   ;;  %s1666_s27 = scalar_lea.hbm %s2066_s12, 16 }
  0x59   :  { %s99_s21 = sshll.u32 %s1729_s20, 4  ;;  %p1667_p12 = scmp.ne.s32.totalorder %s2066_s12, %s1666_s27  ;;  %s100_s21 = int_to_ptr.vmem [resolvable:$true] %s99_s21 }
  0x5a   :  { %p1670_p13 = scmp.lt.u32.totalorder %s1666_s27, %s2066_s12 }
  0x5c   :  { %p1672_p0 = pnand %p1670_p13, %p1667_p12 }
  0x5e   :  { %1675 = shalt.err (!%p1672_p0)
}
  0x5f   :  { %s1676_s30 = scalar_lea.vmem %s100_s21, 16  ;;  %s1680_s10 = scalar_lea.vmem %s100_s21, 32 }
  0x60   :  { %p1677_p1 = scmp.ne.s32.totalorder %s100_s21, %s1676_s30  ;;  %p1681_p2 = scmp.lt.s32.totalorder %s100_s21, %s100_s21 }
  0x61   :  { %p1682_p3 = scmp.lt.s32.totalorder %s1680_s10, %s1676_s30 }
  0x63   :  { %p1683_p4 = por %p1682_p3, %p1681_p2 }
  0x65   :  { %p1684_p5 = pnand %p1683_p4, %p1677_p1 }
  0x67   :  { %1687 = shalt.err (!%p1684_p5)
}
  0x68   :  { %102 = dma.hbm_to_vmem [thread:$0]  %s2066_s12, 16, %s100_s21, [#allocation12]  }
  0x69   :  { %1710 = dma.done.wait [#allocation3], 16384  }
  0x6a   :  { %1711 = vsyncadd [#allocation3], 4294950912 }
  0x6b   :  { %1712 = dma.done.wait [#allocation6], 8208  }
  0x6c   :  { %1713 = vsyncadd [#allocation6], 4294959088 }
  0x6d   :  { %1714 = dma.done.wait [#allocation9], 2064  }
  0x6e   :  { %1715 = vsyncadd [#allocation9], 4294965232 }
  0x6f   :  { %1716 = dma.done.wait [#allocation12], 16  }
  0x70   :  { %1717 = vsyncadd [#allocation12], 4294967280  ;;  %v1730_v0 = vmov 0.0   ;;  %v123_v1 = vld [vmem:[%s2055_s1 + $0x8] sm:$0xff]  ;;  %v125_v2 = vld [vmem:[%s2055_s1 + $0x18] sm:$0xff]  ;;  %vm138_vm0 = vcmask 130048  }
  0x71   :  { %206 = vmatprep.mubr.f32.mxu0 %v1730_v0  ;;  %v122_v3 = vld [vmem:[%s2055_s1] sm:$0xff]  ;;  %v1270_v4 = vpack.c.bf16 %v125_v2, %v123_v1  ;;  %v124_v5 = vld [vmem:[%s2055_s1 + $0x10] sm:$0xff]  ;;  %v228_v6 = vld [vmem:[#allocation2 + $0x8] sm:$0xff]  ;;  %vm1732_vm1 = vmmov 0   ;;  %s1733_s29 = smov [#allocation13]   ;;  %vm1017_vm2 = vcmask 25600  }
  0x72   :  { %v1272_v7 = vpack.c.bf16 %v124_v5, %v122_v3  ;;  %v121_v8 = vld [vmem:[%s2054_s0] sm:$0x3]  ;;  %v232_v9 = vld [vmem:[#allocation2 + $0x28] sm:$0xff]  ;;  %v230_v10 = vld [vmem:[#allocation2 + $0x18] sm:$0xff]  ;;  %s1025_s30 = sshll.u32 %s1733_s29, 4  ;;  %s1026_s30 = int_to_ptr.vmem [resolvable:$true] %s1025_s30 }
  0x73   :  { %v234_v11 = vld [vmem:[#allocation2 + $0x38] sm:$0xff]  ;;  %1271 = vmatprep.subr.bf16.mxu0 %v1270_v4  ;;  %v1274_v12 = vpack.c.bf16 %v232_v9, %v228_v6  ;;  %v227_v14 = vld [vmem:[#allocation2] sm:$0xff]  ;;  %v229_v16 = vld [vmem:[#allocation2 + $0x10] sm:$0xff]  ;;  %s1688_s10 = scalar_lea.vmem %s1026_s30, 32  ;;  %p1693_p7 = scmp.lt.s32.totalorder %s1026_s30, %s1026_s30 }
  0x74   :  { %v1338_v13 = vpack.c.bf16 %v234_v11, %v230_v10  ;;  %v231_v15 = vld [vmem:[#allocation2 + $0x20] sm:$0xff]  ;;  %1273 = vmatpush1.bf16.msra.mxu0 %v1272_v7  ;;  %v233_v18 = vld [vmem:[#allocation2 + $0x30] sm:$0xff]  ;;  %v236_v19 = vld [vmem:[#allocation2 + $0x48] sm:$0xff]  ;;  %p1689_p6 = scmp.ne.s32.totalorder %s1026_s30, %s1688_s10  ;;  %p1694_p8 = scmp.lt.s32.totalorder %s1688_s10, %s1688_s10 }
  0x75   :  { %v1276_v17 = vpack.c.bf16 %v231_v15, %v227_v14  ;;  %v240_v20 = vld [vmem:[#allocation2 + $0x68] sm:$0xff]  ;;  %1275 = vmatprep.subr.bf16.mxu1 %v1274_v12  ;;  %v1340_v21 = vpack.c.bf16 %v233_v18, %v229_v16  ;;  %v238_v23 = vld [vmem:[#allocation2 + $0x58] sm:$0xff]  ;;  %v235_v25 = vld [vmem:[#allocation2 + $0x40] sm:$0xff] }
  0x76   :  { %1339 = vmatprep.subr.bf16.mxu0 %v1338_v13  ;;  %v1278_v22 = vpack.c.bf16 %v240_v20, %v236_v19  ;;  %v242_v24 = vld [vmem:[#allocation2 + $0x78] sm:$0xff]  ;;  %v239_v27 = vld [vmem:[#allocation2 + $0x60] sm:$0xff]  ;;  %v237_v28 = vld [vmem:[#allocation2 + $0x50] sm:$0xff]  ;;  %p1695_p9 = por %p1694_p8, %p1693_p7 }
  0x77   :  { %1277 = vmatpush1.bf16.msra.mxu1 %v1276_v17  ;;  %v1342_v26 = vpack.c.bf16 %v242_v24, %v238_v23  ;;  %v241_v29 = vld [vmem:[#allocation2 + $0x70] sm:$0xff]  ;;  %1037 = vmatmul.mubr.msk.f32.vlgmr.msra.gmra.mrb[0].mxu0 %vm138_vm0, %v121_v8  ;;  %v1280_v30 = vpack.c.bf16 %v239_v27, %v235_v25  ;;  %v244_v31 = vld [vmem:[#allocation2 + $0x88] sm:$0xff]  ;;  %v246_v33 = vld [vmem:[#allocation2 + $0x98] sm:$0xff] }
  0x78   :  { %1279 = vmatprep.subr.bf16.mxu1 %v1278_v22  ;;  %v248_v32 = vld [vmem:[#allocation2 + $0xa8] sm:$0xff]  ;;  %1341 = vmatpush1.bf16.msra.mxu0 %v1340_v21  ;;  %v1344_v34 = vpack.c.bf16 %v241_v29, %v237_v28  ;;  %v250_v36 = vld [vmem:[#allocation2 + $0xb8] sm:$0xff]  ;;  %v243_v37 = vld [vmem:[#allocation2 + $0x80] sm:$0xff]  ;;  %p1696_p10 = pnand %p1695_p9, %p1689_p6 }
  0x79   :  { %v1282_v35 = vpack.c.bf16 %v248_v32, %v244_v31  ;;  %v247_v38 = vld [vmem:[#allocation2 + $0xa0] sm:$0xff]  ;;  %1343 = vmatprep.subr.bf16.mxu0 %v1342_v26  ;;  %v1346_v39 = vpack.c.bf16 %v250_v36, %v246_v33  ;;  %v245_v40 = vld [vmem:[#allocation2 + $0x90] sm:$0xff]  ;;  %v252_v42 = vld [vmem:[#allocation2 + $0xc8] sm:$0xff] }
  0x7a   :  { %v249_v41 = vld [vmem:[#allocation2 + $0xb0] sm:$0xff]  ;;  %v1284_v43 = vpack.c.bf16 %v247_v38, %v243_v37  ;;  %v256_v44 = vld [vmem:[#allocation2 + $0xe8] sm:$0xff]  ;;  %v254_v45 = vld [vmem:[#allocation2 + $0xd8] sm:$0xff] }
  0x7b   :  { %1281 = vmatpush1.bf16.msra.mxu1 %v1280_v30  ;;  %v258_v46 = vld [vmem:[#allocation2 + $0xf8] sm:$0xff]  ;;  %v1286_v47 = vpack.c.bf16 %v256_v44, %v252_v42  ;;  %v251_v48 = vld [vmem:[#allocation2 + $0xc0] sm:$0xff]  ;;  %v1348_v50 = vpack.c.bf16 %v249_v41, %v245_v40  ;;  %v260_v51 = vld [vmem:[#allocation2 + $0x108] sm:$0xff] }
  0x7c   :  { %1283 = vmatprep.subr.bf16.mxu1 %v1282_v35  ;;  %v255_v49 = vld [vmem:[#allocation2 + $0xe0] sm:$0xff]  ;;  %1345 = vmatpush1.bf16.msra.mxu0 %v1344_v34  ;;  %v264_v52 = vld [vmem:[#allocation2 + $0x128] sm:$0xff]  ;;  %v1350_v53 = vpack.c.bf16 %v258_v46, %v254_v45  ;;  %v253_v54 = vld [vmem:[#allocation2 + $0xd0] sm:$0xff] }
  0x7d   :  { %1347 = vmatprep.subr.bf16.mxu0 %v1346_v39  ;;  %v257_v55 = vld [vmem:[#allocation2 + $0xf0] sm:$0xff]  ;;  %v1288_v56 = vpack.c.bf16 %v255_v49, %v251_v48  ;;  %v262_v57 = vld [vmem:[#allocation2 + $0x118] sm:$0xff]  ;;  %v1290_v59 = vpack.c.bf16 %v264_v52, %v260_v51  ;;  %v259_v60 = vld [vmem:[#allocation2 + $0x100] sm:$0xff] }
  0x7e   :  { %v266_v58 = vld [vmem:[#allocation2 + $0x138] sm:$0xff]  ;;  %v263_v61 = vld [vmem:[#allocation2 + $0x120] sm:$0xff]  ;;  %v1352_v62 = vpack.c.bf16 %v257_v55, %v253_v54  ;;  %v268_v63 = vld [vmem:[#allocation2 + $0x148] sm:$0xff] }
  0x7f   :  { %1285 = vmatpush1.bf16.msra.mxu1 %v1284_v43  ;;  %v272_v1 = vld [vmem:[#allocation2 + $0x168] sm:$0xff]  ;;  %v1354_v2 = vpack.c.bf16 %v266_v58, %v262_v57  ;;  %v261_v3 = vld [vmem:[#allocation2 + $0x110] sm:$0xff]  ;;  %v1292_v5 = vpack.c.bf16 %v263_v61, %v259_v60  ;;  %v270_v6 = vld [vmem:[#allocation2 + $0x158] sm:$0xff] }
  0x80   :  { %1287 = vmatprep.subr.bf16.mxu1 %v1286_v47  ;;  %1349 = vmatpush1.bf16.msra.mxu0 %v1348_v50  ;;  %v265_v4 = vld [vmem:[#allocation2 + $0x130] sm:$0xff]  ;;  %v274_v7 = vld [vmem:[#allocation2 + $0x178] sm:$0xff]  ;;  %v1294_v8 = vpack.c.bf16 %v272_v1, %v268_v63  ;;  %v267_v9 = vld [vmem:[#allocation2 + $0x140] sm:$0xff] }
  0x81   :  { %1351 = vmatprep.subr.bf16.mxu0 %v1350_v53  ;;  %v271_v10 = vld [vmem:[#allocation2 + $0x160] sm:$0xff]  ;;  %v1356_v11 = vpack.c.bf16 %v265_v4, %v261_v3  ;;  %v276_v12 = vld [vmem:[#allocation2 + $0x188] sm:$0xff]  ;;  %v1358_v14 = vpack.c.bf16 %v274_v7, %v270_v6  ;;  %v269_v15 = vld [vmem:[#allocation2 + $0x150] sm:$0xff] }
  0x82   :  { %v280_v13 = vld [vmem:[#allocation2 + $0x1a8] sm:$0xff]  ;;  %v273_v16 = vld [vmem:[#allocation2 + $0x170] sm:$0xff]  ;;  %v1296_v17 = vpack.c.bf16 %v271_v10, %v267_v9  ;;  %v278_v18 = vld [vmem:[#allocation2 + $0x198] sm:$0xff] }
  0x83   :  { %1289 = vmatpush1.bf16.msra.mxu1 %v1288_v56  ;;  %v282_v19 = vld [vmem:[#allocation2 + $0x1b8] sm:$0xff]  ;;  %v1298_v20 = vpack.c.bf16 %v280_v13, %v276_v12  ;;  %v275_v21 = vld [vmem:[#allocation2 + $0x180] sm:$0xff]  ;;  %v1360_v23 = vpack.c.bf16 %v273_v16, %v269_v15  ;;  %v284_v24 = vld [vmem:[#allocation2 + $0x1c8] sm:$0xff] }
  0x84   :  { %1291 = vmatprep.subr.bf16.mxu1 %v1290_v59  ;;  %1353 = vmatpush1.bf16.msra.mxu0 %v1352_v62  ;;  %v279_v22 = vld [vmem:[#allocation2 + $0x1a0] sm:$0xff]  ;;  %v288_v25 = vld [vmem:[#allocation2 + $0x1e8] sm:$0xff]  ;;  %v1362_v26 = vpack.c.bf16 %v282_v19, %v278_v18  ;;  %v277_v27 = vld [vmem:[#allocation2 + $0x190] sm:$0xff] }
  0x85   :  { %1355 = vmatprep.subr.bf16.mxu0 %v1354_v2  ;;  %v281_v28 = vld [vmem:[#allocation2 + $0x1b0] sm:$0xff]  ;;  %v1300_v29 = vpack.c.bf16 %v279_v22, %v275_v21  ;;  %v286_v30 = vld [vmem:[#allocation2 + $0x1d8] sm:$0xff]  ;;  %v1302_v32 = vpack.c.bf16 %v288_v25, %v284_v24  ;;  %v283_v33 = vld [vmem:[#allocation2 + $0x1c0] sm:$0xff] }
  0x86   :  { %v290_v31 = vld [vmem:[#allocation2 + $0x1f8] sm:$0xff]  ;;  %v287_v34 = vld [vmem:[#allocation2 + $0x1e0] sm:$0xff]  ;;  %v1364_v35 = vpack.c.bf16 %v281_v28, %v277_v27  ;;  %v292_v36 = vld [vmem:[#allocation2 + $0x208] sm:$0xff] }
  0x87   :  { %1293 = vmatpush1.bf16.msra.mxu1 %v1292_v5  ;;  %v296_v37 = vld [vmem:[#allocation2 + $0x228] sm:$0xff]  ;;  %v1366_v38 = vpack.c.bf16 %v290_v31, %v286_v30  ;;  %v285_v39 = vld [vmem:[#allocation2 + $0x1d0] sm:$0xff]  ;;  %v1304_v41 = vpack.c.bf16 %v287_v34, %v283_v33  ;;  %v294_v42 = vld [vmem:[#allocation2 + $0x218] sm:$0xff] }
  0x88   :  { %1295 = vmatprep.subr.bf16.mxu1 %v1294_v8  ;;  %1357 = vmatpush1.bf16.msra.mxu0 %v1356_v11  ;;  %v289_v40 = vld [vmem:[#allocation2 + $0x1f0] sm:$0xff]  ;;  %v298_v43 = vld [vmem:[#allocation2 + $0x238] sm:$0xff]  ;;  %v1306_v44 = vpack.c.bf16 %v296_v37, %v292_v36  ;;  %v291_v45 = vld [vmem:[#allocation2 + $0x200] sm:$0xff] }
  0x89   :  { %1359 = vmatprep.subr.bf16.mxu0 %v1358_v14  ;;  %v295_v46 = vld [vmem:[#allocation2 + $0x220] sm:$0xff]  ;;  %v1368_v47 = vpack.c.bf16 %v289_v40, %v285_v39  ;;  %v300_v48 = vld [vmem:[#allocation2 + $0x248] sm:$0xff]  ;;  %v1370_v50 = vpack.c.bf16 %v298_v43, %v294_v42  ;;  %v293_v51 = vld [vmem:[#allocation2 + $0x210] sm:$0xff] }
  0x8a   :  { %v304_v49 = vld [vmem:[#allocation2 + $0x268] sm:$0xff]  ;;  %v297_v52 = vld [vmem:[#allocation2 + $0x230] sm:$0xff]  ;;  %v1308_v53 = vpack.c.bf16 %v295_v46, %v291_v45  ;;  %v302_v54 = vld [vmem:[#allocation2 + $0x258] sm:$0xff] }
  0x8b   :  { %1297 = vmatpush1.bf16.msra.mxu1 %v1296_v17  ;;  %v306_v55 = vld [vmem:[#allocation2 + $0x278] sm:$0xff]  ;;  %v1310_v56 = vpack.c.bf16 %v304_v49, %v300_v48  ;;  %v299_v57 = vld [vmem:[#allocation2 + $0x240] sm:$0xff]  ;;  %v1372_v59 = vpack.c.bf16 %v297_v52, %v293_v51  ;;  %v301_v61 = vld [vmem:[#allocation2 + $0x250] sm:$0xff] }
  0x8c   :  { %1299 = vmatprep.subr.bf16.mxu1 %v1298_v20  ;;  %1361 = vmatpush1.bf16.msra.mxu0 %v1360_v23  ;;  %v303_v58 = vld [vmem:[#allocation2 + $0x260] sm:$0xff]  ;;  %v1374_v60 = vpack.c.bf16 %v306_v55, %v302_v54  ;;  %v305_v62 = vld [vmem:[#allocation2 + $0x270] sm:$0xff]  ;;  %v308_v2 = vld [vmem:[#allocation2 + $0x288] sm:$0xff] }
  0x8d   :  { %1363 = vmatprep.subr.bf16.mxu0 %v1362_v26  ;;  %v1312_v63 = vpack.c.bf16 %v303_v58, %v299_v57  ;;  %v1376_v1 = vpack.c.bf16 %v305_v62, %v301_v61  ;;  %v312_v3 = vld [vmem:[#allocation2 + $0x2a8] sm:$0xff]  ;;  %v310_v4 = vld [vmem:[#allocation2 + $0x298] sm:$0xff]  ;;  %v307_v7 = vld [vmem:[#allocation2 + $0x280] sm:$0xff] }
  0x8e   :  { %v1314_v5 = vpack.c.bf16 %v312_v3, %v308_v2  ;;  %v314_v6 = vld [vmem:[#allocation2 + $0x2b8] sm:$0xff]  ;;  %v311_v8 = vld [vmem:[#allocation2 + $0x2a0] sm:$0xff]  ;;  %v309_v11 = vld [vmem:[#allocation2 + $0x290] sm:$0xff] }
  0x8f   :  { %1301 = vmatpush1.bf16.msra.mxu1 %v1300_v29  ;;  %v1378_v9 = vpack.c.bf16 %v314_v6, %v310_v4  ;;  %v1316_v10 = vpack.c.bf16 %v311_v8, %v307_v7  ;;  %v313_v12 = vld [vmem:[#allocation2 + $0x2b0] sm:$0xff]  ;;  %v316_v14 = vld [vmem:[#allocation2 + $0x2c8] sm:$0xff]  ;;  %v318_v16 = vld [vmem:[#allocation2 + $0x2d8] sm:$0xff] }
  0x90   :  { %1303 = vmatprep.subr.bf16.mxu1 %v1302_v32  ;;  %1365 = vmatpush1.bf16.msra.mxu0 %v1364_v35  ;;  %v1380_v13 = vpack.c.bf16 %v313_v12, %v309_v11  ;;  %v320_v15 = vld [vmem:[#allocation2 + $0x2e8] sm:$0xff]  ;;  %v322_v18 = vld [vmem:[#allocation2 + $0x2f8] sm:$0xff]  ;;  %v315_v19 = vld [vmem:[#allocation2 + $0x2c0] sm:$0xff] }
  0x91   :  { %1367 = vmatprep.subr.bf16.mxu0 %v1366_v38  ;;  %v1318_v17 = vpack.c.bf16 %v320_v15, %v316_v14  ;;  %v319_v20 = vld [vmem:[#allocation2 + $0x2e0] sm:$0xff]  ;;  %v1382_v21 = vpack.c.bf16 %v322_v18, %v318_v16  ;;  %v317_v23 = vld [vmem:[#allocation2 + $0x2d0] sm:$0xff]  ;;  %v324_v26 = vld [vmem:[#allocation2 + $0x308] sm:$0xff] }
  0x92   :  { %v1320_v22 = vpack.c.bf16 %v319_v20, %v315_v19  ;;  %v321_v24 = vld [vmem:[#allocation2 + $0x2f0] sm:$0xff]  ;;  %v328_v27 = vld [vmem:[#allocation2 + $0x328] sm:$0xff]  ;;  %v326_v28 = vld [vmem:[#allocation2 + $0x318] sm:$0xff] }
  0x93   :  { %1305 = vmatpush1.bf16.msra.mxu1 %v1304_v41  ;;  %v1384_v25 = vpack.c.bf16 %v321_v24, %v317_v23  ;;  %v1322_v29 = vpack.c.bf16 %v328_v27, %v324_v26  ;;  %v330_v30 = vld [vmem:[#allocation2 + $0x338] sm:$0xff]  ;;  %v323_v31 = vld [vmem:[#allocation2 + $0x300] sm:$0xff]  ;;  %v325_v35 = vld [vmem:[#allocation2 + $0x310] sm:$0xff] }
  0x94   :  { %1307 = vmatprep.subr.bf16.mxu1 %v1306_v44  ;;  %1369 = vmatpush1.bf16.msra.mxu0 %v1368_v47  ;;  %v327_v32 = vld [vmem:[#allocation2 + $0x320] sm:$0xff]  ;;  %v1386_v33 = vpack.c.bf16 %v330_v30, %v326_v28  ;;  %v329_v36 = vld [vmem:[#allocation2 + $0x330] sm:$0xff]  ;;  %v332_v38 = vld [vmem:[#allocation2 + $0x348] sm:$0xff] }
  0x95   :  { %1371 = vmatprep.subr.bf16.mxu0 %v1370_v50  ;;  %v1324_v34 = vpack.c.bf16 %v327_v32, %v323_v31  ;;  %v1388_v37 = vpack.c.bf16 %v329_v36, %v325_v35  ;;  %v336_v39 = vld [vmem:[#allocation2 + $0x368] sm:$0xff]  ;;  %v334_v40 = vld [vmem:[#allocation2 + $0x358] sm:$0xff]  ;;  %v331_v43 = vld [vmem:[#allocation2 + $0x340] sm:$0xff] }
  0x96   :  { %v1326_v41 = vpack.c.bf16 %v336_v39, %v332_v38  ;;  %v338_v42 = vld [vmem:[#allocation2 + $0x378] sm:$0xff]  ;;  %v335_v44 = vld [vmem:[#allocation2 + $0x360] sm:$0xff]  ;;  %v333_v47 = vld [vmem:[#allocation2 + $0x350] sm:$0xff] }
  0x97   :  { %1309 = vmatpush1.bf16.msra.mxu1 %v1308_v53  ;;  %v1390_v45 = vpack.c.bf16 %v338_v42, %v334_v40  ;;  %v1328_v46 = vpack.c.bf16 %v335_v44, %v331_v43  ;;  %v337_v48 = vld [vmem:[#allocation2 + $0x370] sm:$0xff]  ;;  %v340_v50 = vld [vmem:[#allocation2 + $0x388] sm:$0xff]  ;;  %v342_v52 = vld [vmem:[#allocation2 + $0x398] sm:$0xff] }
  0x98   :  { %1311 = vmatprep.subr.bf16.mxu1 %v1310_v56  ;;  %1373 = vmatpush1.bf16.msra.mxu0 %v1372_v59  ;;  %v1392_v49 = vpack.c.bf16 %v337_v48, %v333_v47  ;;  %v344_v51 = vld [vmem:[#allocation2 + $0x3a8] sm:$0xff]  ;;  %v346_v54 = vld [vmem:[#allocation2 + $0x3b8] sm:$0xff]  ;;  %v339_v55 = vld [vmem:[#allocation2 + $0x380] sm:$0xff] }
  0x99   :  { %1375 = vmatprep.subr.bf16.mxu0 %v1374_v60  ;;  %v1330_v53 = vpack.c.bf16 %v344_v51, %v340_v50  ;;  %v343_v56 = vld [vmem:[#allocation2 + $0x3a0] sm:$0xff]  ;;  %v1394_v57 = vpack.c.bf16 %v346_v54, %v342_v52  ;;  %v341_v59 = vld [vmem:[#allocation2 + $0x390] sm:$0xff]  ;;  %v348_v62 = vld [vmem:[#allocation2 + $0x3c8] sm:$0xff] }
  0x9a   :  { %v1332_v58 = vpack.c.bf16 %v343_v56, %v339_v55  ;;  %v345_v60 = vld [vmem:[#allocation2 + $0x3b0] sm:$0xff]  ;;  %v354_v3 = vld [vmem:[#allocation2 + $0x3f8] sm:$0xff]  ;;  %v347_v4 = vld [vmem:[#allocation2 + $0x3c0] sm:$0xff] }
  0x9b   :  { %1313 = vmatpush1.bf16.msra.mxu1 %v1312_v63  ;;  %v1396_v61 = vpack.c.bf16 %v345_v60, %v341_v59  ;;  %v352_v63 = vld [vmem:[#allocation2 + $0x3e8] sm:$0xff]  ;;  %v349_v8 = vld [vmem:[#allocation2 + $0x3d0] sm:$0xff]  ;;  %v539_v11 = vld [vmem:[#allocation5 + $0x80] sm:$0xff] }
  0x9c   :  { %1377 = vmatpush1.bf16.msra.mxu0 %v1376_v1  ;;  %1315 = vmatprep.subr.bf16.mxu1 %v1314_v5  ;;  %v350_v1 = vld [vmem:[#allocation2 + $0x3d8] sm:$0xff]  ;;  %v1334_v2 = vpack.c.bf16 %v352_v63, %v348_v62  ;;  %v351_v5 = vld [vmem:[#allocation2 + $0x3e0] sm:$0xff]  ;;  %v540_v12 = vld [vmem:[#allocation5 + $0x88] sm:$0xff] }
  0x9d   :  { %1379 = vmatprep.subr.bf16.mxu0 %v1378_v9  ;;  %v1398_v6 = vpack.c.bf16 %v354_v3, %v350_v1  ;;  %v1336_v7 = vpack.c.bf16 %v351_v5, %v347_v4  ;;  %v353_v9 = vld [vmem:[#allocation2 + $0x3f0] sm:$0xff]  ;;  %v1402_v14 = vpack.c.bf16 %v540_v12, %v539_v11  ;;  %v572_v15 = vld [vmem:[#allocation5 + $0x188] sm:$0xff]  ;;  %v126_v20 = vld [vmem:[%s2056_s2] sm:$0x3] }
  0x9e   :  { %v523_v36 = vld [vmem:[#allocation5] sm:$0xff]  ;;  %v556_v40 = vld [vmem:[#allocation5 + $0x108] sm:$0xff]  ;;  %v542_v44 = vld [vmem:[#allocation5 + $0x98] sm:$0xff] }
  0x9f   :  { %1317 = vmatpush1.bf16.msra.mxu1 %v1316_v10  ;;  %v1400_v10 = vpack.c.bf16 %v353_v9, %v349_v8  ;;  %v555_v39 = vld [vmem:[#allocation5 + $0x100] sm:$0xff]  ;;  %v525_v51 = vld [vmem:[#allocation5 + $0x10] sm:$0xff]  ;;  %v526_v52 = vld [vmem:[#allocation5 + $0x18] sm:$0xff] }
  0xa0   :  { %1381 = vmatpush1.bf16.msra.mxu0 %v1380_v13  ;;  %1319 = vmatprep.subr.bf16.mxu1 %v1318_v17  ;;  %v571_v13 = vld [vmem:[#allocation5 + $0x180] sm:$0xff]  ;;  %v128_v17 = vlaneseq  ;;  %v1436_v50 = vpack.c.bf16 %v556_v40, %v555_v39  ;;  %v557_v56 = vld [vmem:[#allocation5 + $0x110] sm:$0xff]  ;;  %v544_v59 = vld [vmem:[#allocation5 + $0xa8] sm:$0xff]  ;;  %v1408_v62 = vpack.c.bf16 %v526_v52, %v525_v51 }
  0xa1   :  { %1383 = vmatprep.subr.bf16.mxu0 %v1382_v21  ;;  %v1434_v16 = vpack.c.bf16 %v572_v15, %v571_v13  ;;  %v575_v60 = vld [vmem:[#allocation5 + $0x1a0] sm:$0xff]  ;;  %v546_v8 = vld [vmem:[#allocation5 + $0xb8] sm:$0xff]  ;;  %v577_v9 = vld [vmem:[#allocation5 + $0x1b0] sm:$0xff] }
  0xa2   :  { %v1893_v18 = vshrl.u32 %v128_v17, 7  ;;  %v527_v1 = vld [vmem:[#allocation5 + $0x20] sm:$0xff]  ;;  %v529_v13 = vld [vmem:[#allocation5 + $0x30] sm:$0xff] }
  0xa3   :  { %1321 = vmatpush1.bf16.msra.mxu1 %v1320_v22  ;;  %v559_v5 = vld [vmem:[#allocation5 + $0x120] sm:$0xff]  ;;  %v561_v17 = vld [vmem:[#allocation5 + $0x130] sm:$0xff] }
  0xa4   :  { %1385 = vmatpush1.bf16.msra.mxu0 %v1384_v25  ;;  %1323 = vmatprep.subr.bf16.mxu1 %v1322_v29  ;;  %v130_v19 = vsub.s32 0, %v1893_v18  ;;  %v134_v21 = vsub.s32 1, %v1893_v18  ;;  %v533_v40 = vld [vmem:[#allocation5 + $0x50] sm:$0xff] }
  0xa5   :  { %1387 = vmatprep.subr.bf16.mxu0 %v1386_v33 }
  0xa6   :  { %v131_v22 = vrot.slane %v126_v20, %v130_v19  ;;  %v135_v23 = vrot.slane %v126_v20, %v134_v21  ;;  %v562_v20 = vld [vmem:[#allocation5 + $0x138] sm:$0xff] }
  0xa7   :  { %1325 = vmatpush1.bf16.msra.mxu1 %v1324_v34 }
  0xa8   :  { %1389 = vmatpush1.bf16.msra.mxu0 %v1388_v37  ;;  %1327 = vmatprep.subr.bf16.mxu1 %v1326_v41  ;;  %v524_v37 = vld [vmem:[#allocation5 + $0x8] sm:$0xff]  ;;  %v541_v41 = vld [vmem:[#allocation5 + $0x90] sm:$0xff] }
  0xa9   :  { %1391 = vmatprep.subr.bf16.mxu0 %v1390_v45  ;;  %v573_v45 = vld [vmem:[#allocation5 + $0x190] sm:$0xff]  ;;  %v1406_v54 = vpack.c.bf16 %v542_v44, %v541_v41  ;;  %v534_v41 = vld [vmem:[#allocation5 + $0x58] sm:$0xff] }
  0xaa   :  { %v565_v44 = vld [vmem:[#allocation5 + $0x150] sm:$0xff] }
  0xab   :  { %1329 = vmatpush1.bf16.msra.mxu1 %v1328_v46  ;;  %v574_v46 = vld [vmem:[#allocation5 + $0x198] sm:$0xff] }
  0xac   :  { %1393 = vmatpush1.bf16.msra.mxu0 %v1392_v49  ;;  %1331 = vmatprep.subr.bf16.mxu1 %v1330_v53  ;;  %v1404_v49 = vpack.c.bf16 %v524_v37, %v523_v36  ;;  %v1438_v55 = vpack.c.bf16 %v574_v46, %v573_v45  ;;  %v581_v36 = vld [vmem:[#allocation5 + $0x1d0] sm:$0xff]  ;;  %v582_v37 = vld [vmem:[#allocation5 + $0x1d8] sm:$0xff]  ;;  %v551_v46 = vld [vmem:[#allocation5 + $0xe0] sm:$0xff] }
  0xad   :  { %1395 = vmatprep.subr.bf16.mxu0 %v1394_v57  ;;  %v558_v57 = vld [vmem:[#allocation5 + $0x118] sm:$0xff] }
  0xae   :  { %v1440_v63 = vpack.c.bf16 %v558_v57, %v557_v56  ;;  %v566_v45 = vld [vmem:[#allocation5 + $0x158] sm:$0xff]  ;;  %v567_v56 = vld [vmem:[#allocation5 + $0x160] sm:$0xff] }
  0xaf   :  { %1333 = vmatpush1.bf16.msra.mxu1 %v1332_v58  ;;  %v543_v58 = vld [vmem:[#allocation5 + $0xa0] sm:$0xff]  ;;  %v1456_v51 = vpack.c.bf16 %v566_v45, %v565_v44  ;;  %v745_v44 = vld [vmem:[%s2061_s7 + $0x50] sm:$0xff]  ;;  %v746_v45 = vld [vmem:[%s2061_s7 + $0x58] sm:$0xff] }
  0xb0   :  { %1397 = vmatpush1.bf16.msra.mxu0 %v1396_v61  ;;  %1335 = vmatprep.subr.bf16.mxu1 %v1334_v2  ;;  %v576_v61 = vld [vmem:[#allocation5 + $0x1a8] sm:$0xff]  ;;  %v1410_v3 = vpack.c.bf16 %v544_v59, %v543_v58 }
  0xb1   :  { %1399 = vmatprep.subr.bf16.mxu0 %v1398_v6  ;;  %v528_v2 = vld [vmem:[#allocation5 + $0x28] sm:$0xff]  ;;  %v1442_v4 = vpack.c.bf16 %v576_v61, %v575_v60  ;;  %v553_v60 = vld [vmem:[#allocation5 + $0xf0] sm:$0xff]  ;;  %v554_v61 = vld [vmem:[#allocation5 + $0xf8] sm:$0xff] }
  0xb2   :  { %v560_v6 = vld [vmem:[#allocation5 + $0x128] sm:$0xff]  ;;  %v1412_v11 = vpack.c.bf16 %v528_v2, %v527_v1  ;;  %v586_v1 = vld [vmem:[#allocation5 + $0x1f8] sm:$0xff]  ;;  %v537_v2 = vld [vmem:[#allocation5 + $0x70] sm:$0xff] }
  0xb3   :  { %1337 = vmatpush1.bf16.msra.mxu1 %v1336_v7  ;;  %v545_v7 = vld [vmem:[#allocation5 + $0xb0] sm:$0xff]  ;;  %v1444_v12 = vpack.c.bf16 %v560_v6, %v559_v5  ;;  %v568_v58 = vld [vmem:[#allocation5 + $0x168] sm:$0xff] }
  0xb4   :  { %1401 = vmatpush1.bf16.msra.mxu0 %v1400_v10  ;;  %1403 = vmatprep.subr.bf16.mxu1 %v1402_v14  ;;  %v578_v10 = vld [vmem:[#allocation5 + $0x1b8] sm:$0xff]  ;;  %v1414_v15 = vpack.c.bf16 %v546_v8, %v545_v7  ;;  %v1460_v59 = vpack.c.bf16 %v568_v58, %v567_v56  ;;  %v569_v6 = vld [vmem:[#allocation5 + $0x170] sm:$0xff] }
  0xb5   :  { %1435 = vmatprep.subr.bf16.mxu0 %v1434_v16  ;;  %v530_v14 = vld [vmem:[#allocation5 + $0x38] sm:$0xff]  ;;  %v1446_v16 = vpack.c.bf16 %v578_v10, %v577_v9  ;;  %v1731_v9 = vmov 0.0|0.0   ;;  %v367_v10 = vsub.s32 2, %v1893_v18 }
  0xb6   :  { %v570_v7 = vld [vmem:[#allocation5 + $0x178] sm:$0xff] }
  0xb7   :  { %v1464_v8 = vpack.c.bf16 %v570_v7, %v569_v6  ;;  %v840_v6 = vld [vmem:[#allocation8 + $0x58] sm:$0xff] }
 0x14a   :  { %v208_v24 = vpop.f32.mrb[0].mxu0 }
 0x14b   :  { %v209_v25 = vadd.f32 %v208_v24, %v131_v22  ;;  %v210_v26 = vpop.f32.mrb[1].mxu0  ;;  %v547_v22 = vld [vmem:[#allocation5 + $0xc0] sm:$0xff] }
 0x14c   :  { %v211_v27 = vadd.f32 %v210_v26, %v135_v23  ;;  %v548_v23 = vld [vmem:[#allocation5 + $0xc8] sm:$0xff]  ;;  %v579_v24 = vld [vmem:[#allocation5 + $0x1c0] sm:$0xff]  ;;  %v1416_v26 = vpack.c.bf16 %v530_v14, %v529_v13 }
 0x14d   :  { %v215_v28 = vmin.f32 %v209_v25, 0.0  ;;  %v213_v47 = vmax.f32 %v209_v25, 0.0  ;;  %v580_v25 = vld [vmem:[#allocation5 + $0x1c8] sm:$0xff] }
 0x14e   :  { %v216_v29 = vmin.f32 %v211_v27, 0.0  ;;  %v214_v42 = vmax.f32 %v211_v27, 0.0  ;;  %v1448_v27 = vpack.c.bf16 %v562_v20, %v561_v17 }
 0x14f   :  { %v217_v30 = vmul.f32 1.442695, %v215_v28  ;;  %v531_v28 = vld [vmem:[#allocation5 + $0x40] sm:$0xff] }
 0x150   :  { %v219_v31 = vmul.f32 1.442695, %v216_v29  ;;  %v532_v29 = vld [vmem:[#allocation5 + $0x48] sm:$0xff] }
 0x151   :  { %1552 = vpow2.f32 %v217_v30  ;;  %v1418_v30 = vpack.c.bf16 %v548_v23, %v547_v22 }
 0x152   :  { %1554 = vpow2.f32 %v219_v31  ;;  %v1450_v31 = vpack.c.bf16 %v580_v25, %v579_v24 }
 0x15b   :  { %v1553_v32 = vpop.eup %1552 }
 0x15c   :  { %v1555_v33 = vpop.eup %1554  ;;  %v1038_v34 = vadd.f32 -1.0, %v1553_v32  ;;  %v563_v32 = vld [vmem:[#allocation5 + $0x140] sm:$0xff] }
 0x15d   :  { %v1039_v35 = vadd.f32 -1.0, %v1555_v33  ;;  %v564_v33 = vld [vmem:[#allocation5 + $0x148] sm:$0xff] }
 0x15e   :  { %v223_v38 = vmin.f32 %v1038_v34, 0.0  ;;  %v549_v34 = vld [vmem:[#allocation5 + $0xd0] sm:$0xff]  ;;  %v1452_v39 = vpack.c.bf16 %v564_v33, %v563_v32  ;;  %v738_v33 = vld [vmem:[%s2061_s7 + $0x18] sm:$0xff] }
 0x15f   :  { %v224_v43 = vmin.f32 %v1039_v35, 0.0  ;;  %v550_v35 = vld [vmem:[#allocation5 + $0xd8] sm:$0xff]  ;;  %v737_v32 = vld [vmem:[%s2061_s7 + $0x10] sm:$0xff] }
 0x160   :  { %v225_v53 = vadd.f32 %v223_v38, %v213_v47  ;;  %v1420_v38 = vpack.c.bf16 %v532_v29, %v531_v28  ;;  %v552_v47 = vld [vmem:[#allocation5 + $0xe8] sm:$0xff] }
 0x161   :  { %v226_v48 = vadd.f32 %v224_v43, %v214_v42  ;;  %v1422_v42 = vpack.c.bf16 %v550_v35, %v549_v34  ;;  %v1454_v43 = vpack.c.bf16 %v582_v37, %v581_v36  ;;  %v1426_v52 = vpack.c.bf16 %v552_v47, %v551_v46  ;;  %v739_v35 = vld [vmem:[%s2061_s7 + $0x20] sm:$0xff]  ;;  %v740_v36 = vld [vmem:[%s2061_s7 + $0x28] sm:$0xff] }
 0x162   :  { %v1470_v34 = vpack.c.bf16 %v738_v33, %v737_v32  ;;  %v1473_v37 = vpack.c.bf16 %v740_v36, %v739_v35  ;;  %v1482_v46 = vpack.c.bf16 %v746_v45, %v745_v44  ;;  %v747_v47 = vld [vmem:[%s2061_s7 + $0x60] sm:$0xff]  ;;  %v930_v33 = vld [vmem:[%s2065_s11 + $0x30] sm:$0xff] }
 0x163   :  { %441 = vmatprep.mubr.f32.mxu1 %v226_v48  ;;  %512 = vmatprep.mubr.f32.mxu0 %v226_v48  ;;  %v583_v48 = vld [vmem:[#allocation5 + $0x1e0] sm:$0xff] }
 0x164   :  { %442 = vmatmul.mubr.f32.vlgmr.msra.gmra.mrb[0].mxu1 %v225_v53  ;;  %513 = vmatmul.mubr.f32.vlgmr.msra.gmra.mrb[2].mxu0 %v225_v53  ;;  %v932_v36 = vld [vmem:[%s2065_s11 + $0x40] sm:$0xff] }
 0x165   :  { %1405 = vmatpush3.bf16.msra.mxu1 %v1404_v49  ;;  %1437 = vmatpush3.bf16.msra.mxu0 %v1436_v50  ;;  %v584_v49 = vld [vmem:[#allocation5 + $0x1e8] sm:$0xff]  ;;  %v1424_v50 = vpack.c.bf16 %v534_v41, %v533_v40  ;;  %v743_v41 = vld [vmem:[%s2061_s7 + $0x40] sm:$0xff] }
 0x166   :  { %1407 = vmatprep.subr.bf16.mxu1 %v1406_v54  ;;  %1439 = vmatprep.subr.bf16.mxu0 %v1438_v55  ;;  %v1458_v53 = vpack.c.bf16 %v584_v49, %v583_v48  ;;  %v535_v54 = vld [vmem:[#allocation5 + $0x60] sm:$0xff]  ;;  %v536_v55 = vld [vmem:[#allocation5 + $0x68] sm:$0xff] }
 0x167   :  { %v1428_v57 = vpack.c.bf16 %v536_v55, %v535_v54  ;;  %v748_v48 = vld [vmem:[%s2061_s7 + $0x68] sm:$0xff]  ;;  %v831_v55 = vld [vmem:[#allocation8 + $0x10] sm:$0xff] }
 0x168   :  { %v1485_v49 = vpack.c.bf16 %v748_v48, %v747_v47  ;;  %v830_v54 = vld [vmem:[#allocation8 + $0x8] sm:$0xff]  ;;  %v936_v47 = vld [vmem:[%s2065_s11 + $0x60] sm:$0xff] }
 0x169   :  { %1409 = vmatpush3.bf16.msra.mxu1 %v1408_v62  ;;  %1441 = vmatpush3.bf16.msra.mxu0 %v1440_v63  ;;  %v585_v62 = vld [vmem:[#allocation5 + $0x1f0] sm:$0xff]  ;;  %v1430_v63 = vpack.c.bf16 %v554_v61, %v553_v60  ;;  %v937_v48 = vld [vmem:[%s2065_s11 + $0x68] sm:$0xff] }
 0x16a   :  { %1411 = vmatprep.subr.bf16.mxu1 %v1410_v3  ;;  %1443 = vmatprep.subr.bf16.mxu0 %v1442_v4  ;;  %v538_v3 = vld [vmem:[#allocation5 + $0x78] sm:$0xff]  ;;  %v1462_v4 = vpack.c.bf16 %v586_v1, %v585_v62  ;;  %v834_v60 = vld [vmem:[#allocation8 + $0x28] sm:$0xff] }
 0x16b   :  { %v1432_v5 = vpack.c.bf16 %v538_v3, %v537_v2  ;;  %v835_v62 = vld [vmem:[#allocation8 + $0x30] sm:$0xff]  ;;  %v837_v2 = vld [vmem:[#allocation8 + $0x40] sm:$0xff]  ;;  %v838_v3 = vld [vmem:[#allocation8 + $0x48] sm:$0xff] }
 0x16d   :  { %1413 = vmatpush3.bf16.msra.mxu1 %v1412_v11  ;;  %1445 = vmatpush3.bf16.msra.mxu0 %v1444_v12  ;;  %v355_v11 = vld [vmem:[%s2058_s4] sm:$0xf]  ;;  %v371_v12 = vsub.s32 3, %v1893_v18 }
 0x16e   :  { %1415 = vmatprep.subr.bf16.mxu1 %v1414_v15  ;;  %1447 = vmatprep.subr.bf16.mxu0 %v1446_v16  ;;  %v360_v13 = vrot.slane %v355_v11, %v130_v19  ;;  %v368_v14 = vrot.slane %v355_v11, %v367_v10  ;;  %v364_v15 = vrot.slane %v355_v11, %v134_v21  ;;  %v842_v10 = vld [vmem:[#allocation8 + $0x68] sm:$0xff] }
 0x16f   :  { %v372_v16 = vrot.slane %v355_v11, %v371_v12 }
 0x171   :  { %1417 = vmatpush3.bf16.msra.mxu1 %v1416_v26  ;;  %1449 = vmatpush3.bf16.msra.mxu0 %v1448_v27  ;;  %v735_v26 = vld [vmem:[%s2061_s7] sm:$0xff]  ;;  %v736_v27 = vld [vmem:[%s2061_s7 + $0x8] sm:$0xff] }
 0x172   :  { %1419 = vmatprep.subr.bf16.mxu1 %v1418_v30  ;;  %1451 = vmatprep.subr.bf16.mxu0 %v1450_v31  ;;  %v1467_v21 = vpack.c.bf16 %v736_v27, %v735_v26  ;;  %v844_v26 = vld [vmem:[#allocation8 + $0x78] sm:$0xff] }
 0x175   :  { %1421 = vmatpush3.bf16.msra.mxu1 %v1420_v38  ;;  %1453 = vmatpush3.bf16.msra.mxu0 %v1452_v39  ;;  %v741_v38 = vld [vmem:[%s2061_s7 + $0x30] sm:$0xff]  ;;  %v742_v39 = vld [vmem:[%s2061_s7 + $0x38] sm:$0xff] }
 0x176   :  { %1423 = vmatprep.subr.bf16.mxu1 %v1422_v42  ;;  %1455 = vmatprep.subr.bf16.mxu0 %v1454_v43  ;;  %v1476_v40 = vpack.c.bf16 %v742_v39, %v741_v38  ;;  %v744_v42 = vld [vmem:[%s2061_s7 + $0x48] sm:$0xff]  ;;  %v934_v39 = vld [vmem:[%s2065_s11 + $0x50] sm:$0xff] }
 0x177   :  { %v1479_v43 = vpack.c.bf16 %v744_v42, %v743_v41  ;;  %v1041_v42 = vld [vmem:[#allocation7] ss:$0 sm:$0xff] }
 0x179   :  { %1425 = vmatpush3.bf16.msra.mxu1 %v1424_v50  ;;  %1457 = vmatpush3.bf16.msra.mxu0 %v1456_v51  ;;  %v749_v50 = vld [vmem:[%s2061_s7 + $0x70] sm:$0xff]  ;;  %v750_v51 = vld [vmem:[%s2061_s7 + $0x78] sm:$0xff] }
 0x17a   :  { %1427 = vmatprep.subr.bf16.mxu1 %v1426_v52  ;;  %1459 = vmatprep.subr.bf16.mxu0 %v1458_v53  ;;  %v1488_v52 = vpack.c.bf16 %v750_v51, %v749_v50  ;;  %v829_v53 = vld [vmem:[#allocation8] sm:$0xff]  ;;  %v938_v50 = vld [vmem:[%s2065_s11 + $0x70] sm:$0xff]  ;;  %v939_v51 = vld [vmem:[%s2065_s11 + $0x78] sm:$0xff] }
 0x17b   :  { %v1491_v56 = vpack.c.bf16 %v830_v54, %v829_v53  ;;  %v1042_v53 = vld [vmem:[#allocation10] ss:$0 sm:$0xff] }
 0x17d   :  { %1429 = vmatpush3.bf16.msra.mxu1 %v1428_v57  ;;  %1461 = vmatpush3.bf16.msra.mxu0 %v1460_v59  ;;  %v832_v57 = vld [vmem:[#allocation8 + $0x18] sm:$0xff]  ;;  %v833_v59 = vld [vmem:[#allocation8 + $0x20] sm:$0xff] }
 0x17e   :  { %1431 = vmatprep.subr.bf16.mxu1 %v1430_v63  ;;  %1463 = vmatprep.subr.bf16.mxu0 %v1462_v4  ;;  %v1494_v58 = vpack.c.bf16 %v832_v57, %v831_v55  ;;  %v1497_v61 = vpack.c.bf16 %v834_v60, %v833_v59  ;;  %v836_v63 = vld [vmem:[#allocation8 + $0x38] sm:$0xff]  ;;  %v1503_v4 = vpack.c.bf16 %v838_v3, %v837_v2  ;;  %v1043_v59 = vld [vmem:[#allocation11] ss:$0 sm:$0xff] }
 0x17f   :  { %v1500_v1 = vpack.c.bf16 %v836_v63, %v835_v62 }
 0x181   :  { %1433 = vmatpush3.bf16.msra.mxu1 %v1432_v5  ;;  %1465 = vmatpush3.bf16.msra.mxu0 %v1464_v8  ;;  %v839_v5 = vld [vmem:[#allocation8 + $0x50] sm:$0xff]  ;;  %v841_v8 = vld [vmem:[#allocation8 + $0x60] sm:$0xff] }
 0x182   :  { %1466 = vmatprep.subr.bf16.mxu1 %v1731_v9  ;;  %1490 = vmatprep.subr.bf16.mxu0 %v1731_v9  ;;  %v1506_v7 = vpack.c.bf16 %v840_v6, %v839_v5  ;;  %v1509_v11 = vpack.c.bf16 %v842_v10, %v841_v8 }
 0x237   :  { %v443_v17 = vpop.f32.mrb[0].mxu1  ;;  %v514_v20 = vpop.f32.mrb[2].mxu0 }
 0x238   :  { %v444_v22 = vadd.f32 %v443_v17, %v360_v13  ;;  %v515_v23 = vadd.f32 %v514_v20, %v368_v14  ;;  %v445_v24 = vpop.f32.mrb[1].mxu1  ;;  %v516_v25 = vpop.f32.mrb[3].mxu0  ;;  %v1040_v14 = vld [vmem:[%s2060_s6] ss:$0 sm:$0xff] }
 0x239   :  { %v446_v19 = vadd.f32 %v445_v24, %v364_v15  ;;  %v517_v28 = vadd.f32 %v516_v25, %v372_v16  ;;  %v843_v25 = vld [vmem:[#allocation8 + $0x70] sm:$0xff] }
 0x23a   :  { %v519_v30 = vmax.f32 %v444_v22, 0.0  ;;  %v521_v31 = vmax.f32 %v515_v23, 0.0  ;;  %v1512_v27 = vpack.c.bf16 %v844_v26, %v843_v25 }
 0x23b   :  { %v520_v29 = vmax.f32 %v446_v19, 0.0  ;;  %v522_v18 = vmax.f32 %v517_v28, 0.0  ;;  %v924_v19 = vld [vmem:[%s2065_s11] sm:$0xff]  ;;  %v925_v28 = vld [vmem:[%s2065_s11 + $0x8] sm:$0xff] }
 0x23d   :  { %658 = vmatprep.mubr.f32.mxu1 %v520_v29  ;;  %728 = vmatprep.mubr.f32.mxu0 %v522_v18  ;;  %v926_v29 = vld [vmem:[%s2065_s11 + $0x10] sm:$0xff]  ;;  %v1515_v18 = vpack.c.bf16 %v925_v28, %v924_v19 }
 0x23e   :  { %659 = vmatmul.mubr.f32.vlgmr.msra.gmra.mrb[2].mxu1 %v519_v30  ;;  %729 = vmatmul.mubr.f32.vlgmr.msra.gmra.mrb[4].mxu0 %v521_v31  ;;  %v928_v30 = vld [vmem:[%s2065_s11 + $0x20] sm:$0xff]  ;;  %v929_v31 = vld [vmem:[%s2065_s11 + $0x28] sm:$0xff] }
 0x23f   :  { %1468 = vmatpush3.bf16.msra.mxu1 %v1467_v21  ;;  %1197 = vmatprep.mubr.msk.f32.mxu1 %vm1732_vm1, %v1730_v0  ;;  %v1521_v32 = vpack.c.bf16 %v929_v31, %v928_v30 }
 0x240   :  { %1469 = vmatprep.subr.bf16.mxu1 %v1731_v9  ;;  %1232 = vmatprep.mubr.msk.f32.mxu0 %vm1732_vm1, %v1730_v0 }
 0x241   :  { %1492 = vmatpush3.bf16.msra.mxu0 %v1491_v56 }
 0x242   :  { %1493 = vmatprep.subr.bf16.mxu0 %v1731_v9 }
 0x243   :  { %1471 = vmatpush3.bf16.msra.mxu1 %v1470_v34  ;;  %v931_v34 = vld [vmem:[%s2065_s11 + $0x38] sm:$0xff] }
 0x244   :  { %1472 = vmatprep.subr.bf16.mxu1 %v1731_v9  ;;  %v1524_v35 = vpack.c.bf16 %v931_v34, %v930_v33 }
 0x245   :  { %1495 = vmatpush3.bf16.msra.mxu0 %v1494_v58 }
 0x246   :  { %1496 = vmatprep.subr.bf16.mxu0 %v1731_v9 }
 0x247   :  { %1474 = vmatpush3.bf16.msra.mxu1 %v1473_v37  ;;  %v933_v37 = vld [vmem:[%s2065_s11 + $0x48] sm:$0xff] }
 0x248   :  { %1475 = vmatprep.subr.bf16.mxu1 %v1731_v9  ;;  %v1527_v38 = vpack.c.bf16 %v933_v37, %v932_v36 }
 0x249   :  { %1498 = vmatpush3.bf16.msra.mxu0 %v1497_v61 }
 0x24a   :  { %1499 = vmatprep.subr.bf16.mxu0 %v1731_v9 }
 0x24b   :  { %1477 = vmatpush3.bf16.msra.mxu1 %v1476_v40  ;;  %v935_v40 = vld [vmem:[%s2065_s11 + $0x58] sm:$0xff] }
 0x24c   :  { %1478 = vmatprep.subr.bf16.mxu1 %v1731_v9  ;;  %v1530_v41 = vpack.c.bf16 %v935_v40, %v934_v39 }
 0x24d   :  { %1501 = vmatpush3.bf16.msra.mxu0 %v1500_v1 }
 0x24e   :  { %1502 = vmatprep.subr.bf16.mxu0 %v1731_v9 }
 0x24f   :  { %1480 = vmatpush3.bf16.msra.mxu1 %v1479_v43 }
 0x250   :  { %1481 = vmatprep.subr.bf16.mxu1 %v1731_v9 }
 0x251   :  { %1504 = vmatpush3.bf16.msra.mxu0 %v1503_v4 }
 0x252   :  { %1505 = vmatprep.subr.bf16.mxu0 %v1731_v9 }
 0x253   :  { %1483 = vmatpush3.bf16.msra.mxu1 %v1482_v46 }
 0x254   :  { %1484 = vmatprep.subr.bf16.mxu1 %v1731_v9 }
 0x255   :  { %1507 = vmatpush3.bf16.msra.mxu0 %v1506_v7 }
 0x256   :  { %1508 = vmatprep.subr.bf16.mxu0 %v1731_v9 }
 0x257   :  { %1486 = vmatpush3.bf16.msra.mxu1 %v1485_v49  ;;  %v1533_v49 = vpack.c.bf16 %v937_v48, %v936_v47 }
 0x258   :  { %1487 = vmatprep.subr.bf16.mxu1 %v1731_v9 }
 0x259   :  { %1510 = vmatpush3.bf16.msra.mxu0 %v1509_v11 }
 0x25a   :  { %1511 = vmatprep.subr.bf16.mxu0 %v1731_v9 }
 0x25b   :  { %1489 = vmatpush3.bf16.msra.mxu1 %v1488_v52  ;;  %v1536_v52 = vpack.c.bf16 %v939_v51, %v938_v50 }
 0x25c   :  { %1514 = vmatprep.subr.bf16.mxu1 %v1731_v9 }
 0x25d   :  { %1513 = vmatpush3.bf16.msra.mxu0 %v1512_v27 }
 0x311   :  { %v1076_v12 = vpop.f32.mrb[2].mxu1  ;;  %v1111_v13 = vpop.f32.mrb[4].mxu0 }
 0x312   :  { %v1077_v15 = vpop.f32.mrb[3].mxu1  ;;  %v1112_v16 = vpop.f32.mrb[5].mxu0 }
 0x313   :  { %v1078_v17 = vadd.f32 %v1077_v15, %v1076_v12  ;;  %v1113_v20 = vadd.f32 %v1112_v16, %v1111_v13 }
 0x315   :  { %v661_v22 = vadd.f32 %v1078_v17, %v1040_v14 }
 0x317   :  { %v731_v23 = vadd.f32 %v1113_v20, %v661_v22 }
 0x319   :  { %v734_v24 = vmax.f32 %v731_v23, 0.0 }
 0x31b   :  { %1198 = vmatmul.mubr.f32.vlgmr.msra.gmra.mrb[4].mxu1 %v734_v24 }
 0x31c   :  { %1267 = vmatprep.mubr.msk.f32.mxu1 %vm1732_vm1, %v1730_v0  ;;  %v927_v0 = vld [vmem:[%s2065_s11 + $0x18] sm:$0xff]  ;;  %1516 = vmatpush3.bf16.msra.mxu1 %v1515_v18 }
 0x31d   :  { %v1518_v21 = vpack.c.bf16 %v927_v0, %v926_v29  ;;  %1517 = vmatprep.subr.bf16.mxu1 %v1731_v9 }
 0x320   :  { %1519 = vmatpush3.bf16.msra.mxu1 %v1518_v21 }
 0x321   :  { %1520 = vmatprep.subr.bf16.mxu1 %v1731_v9 }
 0x324   :  { %1522 = vmatpush3.bf16.msra.mxu1 %v1521_v32 }
 0x325   :  { %1523 = vmatprep.subr.bf16.mxu1 %v1731_v9 }
 0x328   :  { %1525 = vmatpush3.bf16.msra.mxu1 %v1524_v35 }
 0x329   :  { %1526 = vmatprep.subr.bf16.mxu1 %v1731_v9 }
 0x32c   :  { %1528 = vmatpush3.bf16.msra.mxu1 %v1527_v38 }
 0x32d   :  { %1529 = vmatprep.subr.bf16.mxu1 %v1731_v9 }
 0x330   :  { %1531 = vmatpush3.bf16.msra.mxu1 %v1530_v41 }
 0x331   :  { %1532 = vmatprep.subr.bf16.mxu1 %v1731_v9 }
 0x334   :  { %1534 = vmatpush3.bf16.msra.mxu1 %v1533_v49 }
 0x335   :  { %1535 = vmatprep.subr.bf16.mxu1 %v1731_v9 }
 0x338   :  { %1537 = vmatpush3.bf16.msra.mxu1 %v1536_v52 }
 0x3ee   :  { %v824_v43 = vpop.f32.mrb[4].mxu1 }
 0x3ef   :  { %v825_v44 = vadd.f32 %v1041_v42, %v824_v43  ;;  %v1199_v45 = vpop.f32.mrb[5].mxu1 }
 0x3f1   :  { %v828_v46 = vmax.f32 %v825_v44, 0.0 }
 0x3f3   :  { %1233 = vmatmul.mubr.f32.vlgmr.msra.gmra.mrb[6].mxu0 %v828_v46 }
 0x4c6   :  { %v918_v54 = vpop.f32.mrb[6].mxu0 }
 0x4c7   :  { %v919_v55 = vadd.f32 %v1042_v53, %v918_v54  ;;  %v1234_v56 = vpop.f32.mrb[7].mxu0 }
 0x4c9   :  { %v922_v57 = vadd.f32 %v919_v55, %v734_v24 }
 0x4cb   :  { %v923_v58 = vmax.f32 %v922_v57, 0.0 }
 0x4cd   :  { %1268 = vmatmul.mubr.f32.vlgmr.msra.gmra.mrb[6].mxu1 %v923_v58 }
 0x5a0   :  { %v1013_v9 = vpop.f32.mrb[6].mxu1 }
 0x5a1   :  { %v1014_v60 = vadd.f32 %v1043_v59, %v1013_v9  ;;  %v1269_v61 = vpop.f32.mrb[7].mxu1 }
 0x5a3   :  { %1018 = vst.msk [vmem:[#allocation13] sm:$0x3] %vm1017_vm2, %v1014_v60 }
 0x5a4   :  { %1699 = shalt.err (!%p1696_p10)
}
 0x5a5   :  { %s1700_s9 = scalar_lea.hbm %s2067_s13, 32 }
 0x5a6   :  { %p1701_p11 = scmp.ne.s32.totalorder %s2067_s13, %s1700_s9  ;;  %p1704_p12 = scmp.lt.u32.totalorder %s1700_s9, %s2067_s13 }
 0x5a8   :  { %p1706_p13 = pnand %p1704_p12, %p1701_p11 }
 0x5aa   :  { %1709 = shalt.err (!%p1706_p13)
}
 0x5ab   :  { %1028 = dma.vmem_to_hbm [thread:$0]  %s1026_s30, 32, %s2067_s13, [#allocation4]  }
 0x5ac   :  { %1718 = dma.done.wait [#allocation4], 32  }
 0x5ad   :  { %1719 = vsyncadd [#allocation4], 4294967264 }
 0x5ae   :  { %1032 = vsyncpa [#allocation3], 1 }
 0x5af   :  { %1033 = vsyncpa [#allocation6], 1 }
 0x5b0   :  { %1034 = vsyncpa [#allocation9], 1 }
 0x5b1   :  { %1035 = vsyncpa [#allocation12], 1 }
 0x5b2   :  { %1036 = vsyncpa [#allocation4], 1 }

</bundles_post_ra>
